<compile_context>
chip_gen: v6e
topology: v6e:2x2x1
jax: 0.10.0
libtpu: 0.0.40
codegen_flags: <defaults>
</compile_context>

<pallas_src>
import functools

import jax
import jax.numpy as jnp
from jax.experimental import pallas as pl
from jax.experimental.pallas import tpu as pltpu


def _round_up(x: int, m: int) -> int:
    return ((x + m - 1) // m) * m


# If the whole batch fits in one large tile but is at least this big, split it
# into two grid steps so v7x's two TensorCores both get work.
_MIN_SPLIT_BATCH = 512


def _make_mlp_kernel(n_layers: int, state_size: int):
    """Fused MLP over one batch tile. x:(TB,S) f32, w:(L,P,P) bf16, b:(L,1,P) f32."""

    def kernel(x_ref, w_ref, b_ref, o_ref):
        h = x_ref[...]                                   # (TB, S) f32
        for i in range(n_layers):                        # static unroll, L is small
            lhs = h.astype(jnp.bfloat16)                 # MXU-native operand dtype
            if i == 0:
                # Contract only over the real input lanes; avoids lane-padding
                # the activation stream in the wrapper.
                w = w_ref[0, :state_size, :]             # (S, P) bf16
            else:
                w = w_ref[i]                             # (P, P) bf16, VMEM-resident
            h = jnp.dot(lhs, w, preferred_element_type=jnp.float32) + b_ref[i]
            if i < n_layers - 1:
                h = jnp.maximum(h, 0.0)                  # hidden_activation = relu (f32)
            else:
                h = jax.nn.sigmoid(h)                    # output_activation = sigmoid (f32)
        o_ref[...] = h.astype(o_ref.dtype)

    return kernel


def pack_mlp_decoder_params(weights, biases):
    """One-time packing of per-layer params into lane-dense, zero-padded slabs.

    Call this once at parameter-load time (NOT per forward).

    weights: list of (in_dim, out_dim) arrays  (= W_pt.T)
    biases : list of (1, out_dim) or (out_dim,) arrays
    returns: (w_slab (L,P,P) bf16, b_slab (L,1,P) f32)
    """
    n_layers = len(weights)
    state_size = weights[0].shape[0]
    dims = [state_size] + [w.shape[1] for w in weights]
    P = max(_round_up(d, 128) for d in dims)

    # Zero init is load-bearing: padded weight cols + zero bias keep padded
    # activation lanes exactly 0 through every hidden ReLU layer.
    w_slab = jnp.zeros((n_layers, P, P), jnp.bfloat16)
    b_slab = jnp.zeros((n_layers, 1, P), jnp.float32)
    for i, (w, b) in enumerate(zip(weights, biases)):
        in_d, out_d = w.shape
        w_slab = w_slab.at[i, :in_d, :out_d].set(w.astype(jnp.bfloat16))
        b_slab = b_slab.at[i, :, :out_d].set(
            jnp.reshape(b, (1, out_d)).astype(jnp.float32)
        )
    return w_slab, b_slab


@functools.partial(jax.jit, static_argnames=("n_classes", "batch_tile"))
def mlp_decoder_forward(latent, w_slab, b_slab, *, n_classes: int,
                        batch_tile: int = 2048):
    """MLPDecoder forward as a single Pallas kernel, tiled over batch.

    latent : (B, state_size) float array
    w_slab : (L, P, P) bf16   packed weights (pack_mlp_decoder_params)
    b_slab : (L, 1, P) f32    packed biases
    returns: (B, n_classes) float32
    """
    n_layers, P, _ = w_slab.shape
    B, state_size = latent.shape

    # --- batch tiling -----------------------------------------------------
    B8 = _round_up(max(B, 1), 8)
    TB = _round_up(min(batch_tile, B8), 8)
    if TB == B8 and B8 >= _MIN_SPLIT_BATCH:
        # Single big tile -> split into 2 grid steps for v7x megacore sharding.
        TB = _round_up(pl.cdiv(B8, 2), 8)
    B_pad = _round_up(B8, TB)
    n_tiles = B_pad // TB

    x = latent.astype(jnp.float32)
    if B_pad != B:
        # Cheap batch-row-only pad (no lane padding materialized).
        x = jnp.pad(x, ((0, B_pad - B), (0, 0)))

    kernel = _make_mlp_kernel(n_layers, state_size)

    flops = 2 * B_pad * P * P * n_layers
    bytes_accessed = 4 * x.size + 2 * w_slab.size + 4 * b_slab.size + 4 * B_pad * P
    cost = pl.CostEstimate(
        flops=flops, transcendentals=B_pad * P, bytes_accessed=bytes_accessed
    )

    out_padded = pl.pallas_call(
        kernel,
        out_shape=jax.ShapeDtypeStruct((B_pad, P), jnp.float32),
        grid=(n_tiles,),
        in_specs=[
            # (TB, state_size): last dim equals full array dim -> valid block.
            pl.BlockSpec((TB, state_size), lambda i: (i, 0)),
            # Weights / biases: constant index_map -> VMEM-resident across grid.
            pl.BlockSpec((n_layers, P, P), lambda i: (0, 0, 0)),
            pl.BlockSpec((n_layers, 1, P), lambda i: (0, 0, 0)),
        ],
        out_specs=pl.BlockSpec((TB, P), lambda i: (i, 0)),
        compiler_params=pltpu.CompilerParams(
            dimension_semantics=("parallel",),
        ),
        cost_estimate=cost,
    )(x, w_slab, b_slab)

    # Strip batch padding and lane padding (padded output lanes hold sigmoid(0)).
    return out_padded[:B, :n_classes]


def init_mlp_decoder_params(key, state_size, hidden_layers, n_classes):
    """Deterministic synthetic init matching nn.Linear shapes (transposed)."""
    dim_layers = [state_size] + list(hidden_layers) + [n_classes]
    weights, biases = [], []
    for in_dim, out_dim in zip(dim_layers, dim_layers[1:]):
        key, kw, kb = jax.random.split(key, 3)
        bound = 1.0 / (in_dim ** 0.5)
        w = jax.random.uniform(kw, (in_dim, out_dim), jnp.float32, -bound, bound)
        b = jax.random.uniform(kb, (1, out_dim), jnp.float32, -bound, bound)
        weights.append(w)
        biases.append(b)
    return weights, biases


def mlp_decoder_reference(latent, weights, biases):
    """Pure-JAX f32 reference for correctness checking."""
    h = latent
    for i, (w, b) in enumerate(zip(weights, biases)):
        h = h @ w + b.reshape(1, -1)
        if i < len(weights) - 1:
            h = jnp.maximum(h, 0.0)
        else:
            h = jax.nn.sigmoid(h)
    return h


if __name__ == "__main__":
    # Shapes consistent with the module: batch=8, state_size=32,
    # hidden_layers=(64, 32), n_classes=2.
    state_size = 32
    hidden_layers = (64, 32)
    n_classes = 2
    batch = 8

    key = jax.random.PRNGKey(0)
    key, k_latent = jax.random.split(key)
    latent = jax.random.normal(k_latent, (batch, state_size), jnp.float32)

    weights, biases = init_mlp_decoder_params(
        key, state_size, hidden_layers, n_classes
    )

    # Pack parameters ONCE (outside the per-call hot path).
    w_slab, b_slab = pack_mlp_decoder_params(weights, biases)

    out = mlp_decoder_forward(latent, w_slab, b_slab, n_classes=n_classes)
    out = jax.block_until_ready(out)

    ref = mlp_decoder_reference(latent, weights, biases)
    assert out.shape == (batch, n_classes), out.shape
    # Tolerance loosened for bf16 matmul operands (f32 accumulation keeps the
    # error to the bf16 input-rounding level; sigmoid output is in [0, 1]).
    assert jnp.allclose(out, ref, atol=2e-2, rtol=2e-2), (
        "Pallas output mismatch vs reference: "
        f"max abs diff = {jnp.max(jnp.abs(out - ref))}"
    )

    print("KERNEL_OK")
</pallas_src>

<mosaic_0001>
module attributes {stable_mosaic.version = 11 : i64} {
  func.func @kernel(%arg0: i32, %arg1: memref<8x32xf32, #tpu.memory_space<vmem>>, %arg2: memref<3x128x128xbf16, #tpu.memory_space<vmem>>, %arg3: memref<3x1x128xf32, #tpu.memory_space<vmem>>, %arg4: memref<8x128xf32, #tpu.memory_space<vmem>>) attributes {dimension_semantics = [#tpu.dimension_semantics<parallel>], iteration_bounds = array<i64: 1>, scalar_prefetch = 0 : i64, scratch_operands = 0 : i64, tpu.core_type = #tpu.core_type<tc>, window_params = [{transform_indices = @transform_0, window_bounds = array<i64: 8, 32>}, {pipeline_mode = #tpu.pipeline_mode<synchronous>, transform_indices = @transform_1, window_bounds = array<i64: 3, 128, 128>}, {pipeline_mode = #tpu.pipeline_mode<synchronous>, transform_indices = @transform_2, window_bounds = array<i64: 3, 1, 128>}, {transform_indices = @transform_3, window_bounds = array<i64: 8, 128>}]} {
    %c0 = arith.constant 0 : index
    %c0_0 = arith.constant 0 : index
    %0 = vector.load %arg1[%c0, %c0_0] : memref<8x32xf32, #tpu.memory_space<vmem>>, vector<8x32xf32>
    %1 = arith.truncf %0 : vector<8x32xf32> to vector<8x32xbf16>
    %c0_1 = arith.constant 0 : index
    %c0_2 = arith.constant 0 : index
    %c0_3 = arith.constant 0 : index
    %2 = vector.load %arg2[%c0_1, %c0_2, %c0_3] : memref<3x128x128xbf16, #tpu.memory_space<vmem>>, vector<1x32x128xbf16>
    %3 = vector.shape_cast %2 : vector<1x32x128xbf16> to vector<32x128xbf16>
    %cst = arith.constant dense<0.000000e+00> : vector<8x128xf32>
    %4 = tpu.matmul %1, %3, %cst {dimension_numbers = #tpu.dot_dimension_numbers<[1], [0], [0], [1], [0, 0, 1, 1], [], []>} : vector<8x32xbf16>, vector<32x128xbf16>, vector<8x128xf32> -> vector<8x128xf32>
    %c0_4 = arith.constant 0 : index
    %c0_5 = arith.constant 0 : index
    %c0_6 = arith.constant 0 : index
    %5 = vector.load %arg3[%c0_4, %c0_5, %c0_6] : memref<3x1x128xf32, #tpu.memory_space<vmem>>, vector<1x1x128xf32>
    %6 = vector.shape_cast %5 : vector<1x1x128xf32> to vector<1x128xf32>
    %7 = vector.broadcast %6 : vector<1x128xf32> to vector<8x128xf32>
    %8 = arith.addf %4, %7 : vector<8x128xf32>
    %cst_7 = arith.constant 0.000000e+00 : f32
    %9 = vector.broadcast %cst_7 : f32 to vector<8x128xf32>
    %10 = arith.maximumf %8, %9 : vector<8x128xf32>
    %11 = arith.truncf %10 : vector<8x128xf32> to vector<8x128xbf16>
    %c1 = arith.constant 1 : index
    %c0_8 = arith.constant 0 : index
    %c0_9 = arith.constant 0 : index
    %12 = vector.load %arg2[%c1, %c0_8, %c0_9] : memref<3x128x128xbf16, #tpu.memory_space<vmem>>, vector<1x128x128xbf16>
    %13 = vector.shape_cast %12 : vector<1x128x128xbf16> to vector<128x128xbf16>
    %cst_10 = arith.constant dense<0.000000e+00> : vector<8x128xf32>
    %14 = tpu.matmul %11, %13, %cst_10 {dimension_numbers = #tpu.dot_dimension_numbers<[1], [0], [0], [1], [0, 0, 1, 1], [], []>} : vector<8x128xbf16>, vector<128x128xbf16>, vector<8x128xf32> -> vector<8x128xf32>
    %c1_11 = arith.constant 1 : index
    %c0_12 = arith.constant 0 : index
    %c0_13 = arith.constant 0 : index
    %15 = vector.load %arg3[%c1_11, %c0_12, %c0_13] : memref<3x1x128xf32, #tpu.memory_space<vmem>>, vector<1x1x128xf32>
    %16 = vector.shape_cast %15 : vector<1x1x128xf32> to vector<1x128xf32>
    %17 = vector.broadcast %16 : vector<1x128xf32> to vector<8x128xf32>
    %18 = arith.addf %14, %17 : vector<8x128xf32>
    %cst_14 = arith.constant 0.000000e+00 : f32
    %19 = vector.broadcast %cst_14 : f32 to vector<8x128xf32>
    %20 = arith.maximumf %18, %19 : vector<8x128xf32>
    %21 = arith.truncf %20 : vector<8x128xf32> to vector<8x128xbf16>
    %c2 = arith.constant 2 : index
    %c0_15 = arith.constant 0 : index
    %c0_16 = arith.constant 0 : index
    %22 = vector.load %arg2[%c2, %c0_15, %c0_16] : memref<3x128x128xbf16, #tpu.memory_space<vmem>>, vector<1x128x128xbf16>
    %23 = vector.shape_cast %22 : vector<1x128x128xbf16> to vector<128x128xbf16>
    %cst_17 = arith.constant dense<0.000000e+00> : vector<8x128xf32>
    %24 = tpu.matmul %21, %23, %cst_17 {dimension_numbers = #tpu.dot_dimension_numbers<[1], [0], [0], [1], [0, 0, 1, 1], [], []>} : vector<8x128xbf16>, vector<128x128xbf16>, vector<8x128xf32> -> vector<8x128xf32>
    %c2_18 = arith.constant 2 : index
    %c0_19 = arith.constant 0 : index
    %c0_20 = arith.constant 0 : index
    %25 = vector.load %arg3[%c2_18, %c0_19, %c0_20] : memref<3x1x128xf32, #tpu.memory_space<vmem>>, vector<1x1x128xf32>
    %26 = vector.shape_cast %25 : vector<1x1x128xf32> to vector<1x128xf32>
    %27 = vector.broadcast %26 : vector<1x128xf32> to vector<8x128xf32>
    %28 = arith.addf %24, %27 : vector<8x128xf32>
    %29 = arith.negf %28 : vector<8x128xf32>
    %30 = math.exp %29 : vector<8x128xf32>
    %cst_21 = arith.constant 1.000000e+00 : f32
    %31 = vector.broadcast %cst_21 : f32 to vector<8x128xf32>
    %32 = arith.addf %31, %30 : vector<8x128xf32>
    %33 = arith.divf %31, %32 : vector<8x128xf32>
    %c0_22 = arith.constant 0 : index
    %c0_23 = arith.constant 0 : index
    %34 = vector.load %arg4[%c0_22, %c0_23] : memref<8x128xf32, #tpu.memory_space<vmem>>, vector<8x128xf32>
    tpu.vector_store %arg4[%c0_22, %c0_23], %33 {strides = array<i32>} : memref<8x128xf32, #tpu.memory_space<vmem>>, vector<8x128xf32>,
    return
  }
  func.func @transform_0(%arg0: i32) -> (i32, i32) {
    %c0_i32 = arith.constant 0 : i32
    %c0_i32_0 = arith.constant 0 : i32
    return %arg0, %c0_i32 : i32, i32
  }
  func.func @transform_1(%arg0: i32) -> (i32, i32, i32) {
    %c0_i32 = arith.constant 0 : i32
    %c0_i32_0 = arith.constant 0 : i32
    %c0_i32_1 = arith.constant 0 : i32
    %c0_i32_2 = arith.constant 0 : i32
    return %c0_i32, %c0_i32_0, %c0_i32_1 : i32, i32, i32
  }
  func.func @transform_2(%arg0: i32) -> (i32, i32, i32) {
    %c0_i32 = arith.constant 0 : i32
    %c0_i32_0 = arith.constant 0 : i32
    %c0_i32_1 = arith.constant 0 : i32
    %c0_i32_2 = arith.constant 0 : i32
    return %c0_i32, %c0_i32_0, %c0_i32_1 : i32, i32, i32
  }
  func.func @transform_3(%arg0: i32) -> (i32, i32) {
    %c0_i32 = arith.constant 0 : i32
    %c0_i32_0 = arith.constant 0 : i32
    return %arg0, %c0_i32 : i32, i32
  }
}

</mosaic_0001>

<bundles_post_ra>
// kernel: mlp_decoder_forward.1
= control target key start
LH: loop header
LB: loop body
LE: loop exit
PB: predicated region body
PF: predicated region fallthrough
CT: control target
= control target key end

     0   :  { %8 = vsyncpa [#allocation3], 0  ;;  %s587_s0 = inlined_call_operand.hbm [shape: f32[8,32], index: 0, kind: input, shape index: {}]   ;;  %s588_s1 = inlined_call_operand.hbm [shape: bf16[3,128,128], index: 1, kind: input, shape index: {}]   ;;  %s589_s2 = inlined_call_operand.vmem [shape: f32[3,1,128], index: 2, kind: input, shape index: {}]   ;;  %s590_s3 = inlined_call_operand.vmem [shape: f32[8,128], index: 3, kind: output, shape index: {}]  }
   0x1   :  { %9 = vsyncpa [#allocation5], 0  ;;  %s519_s12 = smov [#allocation2]   ;;  %s520_s14 = smov [#allocation4]  }
   0x2   :  { %s16_s13 = sshll.u32 %s519_s12, 4  ;;  %s25_s15 = sshll.u32 %s520_s14, 4  ;;  %s17_s13 = int_to_ptr.vmem [resolvable:$true] %s16_s13  ;;  %s26_s15 = int_to_ptr.vmem [resolvable:$true] %s25_s15 }
   0x3   :  { %s483_s16 = scalar_lea.vmem %s17_s13, 128  ;;  %p488_p1 = scmp.lt.s32.totalorder %s17_s13, %s17_s13 }
   0x4   :  { %p484_p0 = scmp.ne.s32.totalorder %s17_s13, %s483_s16  ;;  %p489_p2 = scmp.lt.s32.totalorder %s483_s16, %s483_s16 }
   0x6   :  { %p490_p3 = por %p489_p2, %p488_p1 }
   0x8   :  { %p491_p4 = pnand %p490_p3, %p484_p0 }
   0xa   :  { %494 = shalt.err (!%p491_p4)
}
   0xb   :  { %19 = dma.hbm_to_vmem [thread:$0]  %s587_s0, 128, %s17_s13, [#allocation3]  }
   0xc   :  { %s503_s19 = scalar_lea.vmem %s26_s15, 3072  ;;  %p508_p6 = scmp.lt.s32.totalorder %s26_s15, %s26_s15 }
   0xd   :  { %p504_p5 = scmp.ne.s32.totalorder %s26_s15, %s503_s19  ;;  %p509_p7 = scmp.lt.s32.totalorder %s503_s19, %s503_s19 }
   0xf   :  { %p510_p8 = por %p509_p7, %p508_p6 }
  0x11   :  { %p511_p9 = pnand %p510_p8, %p504_p5 }
  0x13   :  { %514 = shalt.err (!%p511_p9)
}
  0x14   :  { %s521_s20 = smov 64   ;;  %s522_s21 = smov 4  }
  0x15   :  { %31 = dma.hbm_to_vmem [thread:$0]  %s588_s1, 3072, %s26_s15, [#allocation5], %s521_s20, %s521_s20, %s522_s21  }
  0x16   :  { %515 = dma.done.wait [#allocation3], 128  }
  0x17   :  { %516 = vsyncadd [#allocation3], 4294967168 }
  0x18   :  { %517 = dma.done.wait [#allocation5], 3072  }
  0x19   :  { %518 = vsyncadd [#allocation5], 4294964224  ;;  %v523_v0 = vmov 0.0   ;;  %vm524_vm0 = vmmov 0   ;;  %v453_v1 = vld [vmem:[#allocation4 + $0x8] sm:$0xff]   ;;  %v454_v2 = vld [vmem:[#allocation4] sm:$0xff]  }
  0x1a   :  { %399 = vmatprep.subr.bf16.mxu0 %v523_v0  ;;  %403 = vmatprep.mubr.msk.bf16.mxu0 %vm524_vm0, %v523_v0  ;;  %v41_v3 = vld [vmem:[#allocation2] sm:$0xff]  ;;  %v456_v6 = vld [vmem:[#allocation4 + $0x70] sm:$0xff]   ;;  %vm66_vm1 = vcmask 261120   ;;  %v457_v7 = vld [vmem:[#allocation4 + $0x68] sm:$0xff]  }
  0x1b   :  { %407 = vmatprep.subr.bf16.mxu1 %v523_v0  ;;  %423 = vmatprep.mubr.msk.bf16.mxu1 %vm524_vm0, %v523_v0  ;;  %v455_v4 = vld [vmem:[#allocation4 + $0x78] sm:$0xff]   ;;  %v42_v5 = vpack.c.bf16 %v41_v3, %v41_v3  ;;  %v458_v8 = vld [vmem:[#allocation4 + $0x60] sm:$0xff]   ;;  %v460_v10 = vld [vmem:[#allocation4 + $0x50] sm:$0xff]  }
  0x1c   :  { %400 = vmatpush3.bf16.msra.mxu0 %v453_v1  ;;  %408 = vmatpush3.bf16.msra.mxu1 %v455_v4  ;;  %v459_v9 = vld [vmem:[#allocation4 + $0x58] sm:$0xff]   ;;  %v461_v11 = vld [vmem:[#allocation4 + $0x48] sm:$0xff]   ;;  %v462_v12 = vld [vmem:[#allocation4 + $0x40] sm:$0xff]  }
  0x1d   :  { %401 = vmatprep.subr.bf16.mxu0 %v523_v0  ;;  %409 = vmatprep.subr.bf16.mxu1 %v523_v0  ;;  %v463_v13 = vld [vmem:[#allocation4 + $0xb8] sm:$0xff]   ;;  %v464_v14 = vld [vmem:[#allocation4 + $0xb0] sm:$0xff]   ;;  %v465_v15 = vld [vmem:[#allocation4 + $0xa8] sm:$0xff]  }
  0x1e   :  { %v466_v16 = vld [vmem:[#allocation4 + $0xa0] sm:$0xff]   ;;  %v467_v17 = vld [vmem:[#allocation4 + $0x98] sm:$0xff]   ;;  %v468_v18 = vld [vmem:[#allocation4 + $0x90] sm:$0xff]  }
  0x1f   :  { %v353_v19 = vld [vmem:[%s589_s2] ss:$0 sm:$0xff]  ;;  %v469_v27 = vld [vmem:[#allocation4 + $0x88] sm:$0xff]   ;;  %v470_v28 = vld [vmem:[#allocation4 + $0x80] sm:$0xff]  }
  0x20   :  { %402 = vmatpush3.bf16.msra.mxu0 %v454_v2  ;;  %410 = vmatpush3.bf16.msra.mxu1 %v456_v6  ;;  %v358_v29 = vld [vmem:[%s589_s2 + $0x1] ss:$0 sm:$0xff]  ;;  %v368_v37 = vld [vmem:[%s589_s2 + $0x2] ss:$0 sm:$0xff] }
  0x21   :  { %427 = vmatprep.subr.bf16.mxu0 %v523_v0  ;;  %411 = vmatprep.subr.bf16.mxu1 %v523_v0 }
  0x23   :  { %404 = vmatmul.mubr.msk.bf16.vlgmr.msra.gmra.mxu0 %vm66_vm1, %v42_v5 }
  0x24   :  { %443 = vmatprep.mubr.msk.bf16.mxu0 %vm524_vm0, %v523_v0  ;;  %412 = vmatpush3.bf16.msra.mxu1 %v457_v7 }
  0x25   :  { %413 = vmatprep.subr.bf16.mxu1 %v523_v0  ;;  %428 = vmatpush3.bf16.msra.mxu0 %v463_v13 }
  0x26   :  { %429 = vmatprep.subr.bf16.mxu0 %v523_v0 }
  0x28   :  { %414 = vmatpush3.bf16.msra.mxu1 %v458_v8 }
  0x29   :  { %415 = vmatprep.subr.bf16.mxu1 %v523_v0  ;;  %430 = vmatpush3.bf16.msra.mxu0 %v464_v14 }
  0x2a   :  { %431 = vmatprep.subr.bf16.mxu0 %v523_v0 }
  0x2c   :  { %416 = vmatpush3.bf16.msra.mxu1 %v459_v9 }
  0x2d   :  { %417 = vmatprep.subr.bf16.mxu1 %v523_v0  ;;  %432 = vmatpush3.bf16.msra.mxu0 %v465_v15 }
  0x2e   :  { %433 = vmatprep.subr.bf16.mxu0 %v523_v0 }
  0x30   :  { %418 = vmatpush3.bf16.msra.mxu1 %v460_v10 }
  0x31   :  { %419 = vmatprep.subr.bf16.mxu1 %v523_v0  ;;  %434 = vmatpush3.bf16.msra.mxu0 %v466_v16 }
  0x32   :  { %435 = vmatprep.subr.bf16.mxu0 %v523_v0 }
  0x34   :  { %420 = vmatpush3.bf16.msra.mxu1 %v461_v11 }
  0x35   :  { %421 = vmatprep.subr.bf16.mxu1 %v523_v0  ;;  %436 = vmatpush3.bf16.msra.mxu0 %v467_v17 }
  0x36   :  { %437 = vmatprep.subr.bf16.mxu0 %v523_v0 }
  0x38   :  { %422 = vmatpush3.bf16.msra.mxu1 %v462_v12 }
  0x39   :  { %438 = vmatpush3.bf16.msra.mxu0 %v468_v18 }
  0x3a   :  { %439 = vmatprep.subr.bf16.mxu0 %v523_v0 }
  0x3d   :  { %440 = vmatpush3.bf16.msra.mxu0 %v469_v27 }
  0x3e   :  { %441 = vmatprep.subr.bf16.mxu0 %v523_v0 }
  0x41   :  { %442 = vmatpush3.bf16.msra.mxu0 %v470_v28 }
  0xe3   :  { %v104_v20 = vpop.f32.mrf.mxu0 }
  0xe4   :  { %v105_v21 = vadd.f32 %v353_v19, %v104_v20 }
  0xe5   :  { %v405_v22 = vpop.f32.mrf.mxu0 }
  0xe6   :  { %v110_v23 = vmax.f32 %v105_v21, 0.0 }
  0xe7   :  { %v107_v24 = vpop.f32.mrf.mxu0 }
  0xe8   :  { %v111_v25 = vpack.c.bf16 %v110_v23, %v110_v23 }
  0xe9   :  { %v406_v26 = vpop.f32.mrf.mxu0 }
  0xea   :  { %424 = vmatmul.mubr.bf16.vlgmr.msra.gmra.mxu1 %v111_v25 }
 0x1aa   :  { %v219_v30 = vpop.f32.mrf.mxu1 }
 0x1ab   :  { %v220_v31 = vadd.f32 %v358_v29, %v219_v30 }
 0x1ac   :  { %v425_v32 = vpop.f32.mrf.mxu1 }
 0x1ad   :  { %v225_v33 = vmax.f32 %v220_v31, 0.0 }
 0x1ae   :  { %v222_v34 = vpop.f32.mrf.mxu1 }
 0x1af   :  { %v226_v35 = vpack.c.bf16 %v225_v33, %v225_v33 }
 0x1b0   :  { %v426_v36 = vpop.f32.mrf.mxu1 }
 0x1b1   :  { %444 = vmatmul.mubr.bf16.vlgmr.msra.gmra.mxu0 %v226_v35 }
 0x271   :  { %v334_v38 = vpop.f32.mrf.mxu0 }
 0x272   :  { %v335_v39 = vadd.f32 %v368_v37, %v334_v38 }
 0x273   :  { %v445_v40 = vpop.f32.mrf.mxu0 }
 0x274   :  { %v377_v41 = vmul.f32 -1.442695, %v335_v39 }
 0x275   :  { %v337_v42 = vpop.f32.mrf.mxu0 }
 0x276   :  { %471 = vpow2.f32 %v377_v41 }
 0x277   :  { %v446_v43 = vpop.f32.mrf.mxu0 }
 0x283   :  { %v472_v44 = vpop.eup %471 }
 0x284   :  { %v343_v45 = vadd.f32 1.0, %v472_v44 }
 0x286   :  { %473 = vrcp.f32 %v343_v45 }
 0x293   :  { %v474_v46 = vpop.eup %473 }
 0x294   :  { %346 = vst [vmem:[%s590_s3] sm:$0xff] %v474_v46 }
 0x295   :  { %351 = vsyncpa [#allocation3], 1 }
 0x296   :  { %352 = vsyncpa [#allocation5], 1 }

</bundles_post_ra>
